<compile_context>
chip_gen: v7x
topology: tpu7x:2x2x1
jax: 0.10.0
libtpu: 0.0.40
codegen_flags: <defaults>
</compile_context>

<pallas_src>
import functools

import jax
import jax.numpy as jnp
from jax.experimental import pallas as pl
from jax.experimental.pallas import tpu as pltpu


def _vmem_limit_bytes():
    """Generation-aware VMEM limit (v7x: 64 MiB physical; v5e/v6e: 128 MiB)."""
    cap = 64 * 1024 * 1024
    try:
        cap = int(pltpu.get_tpu_info().vmem_capacity_bytes)
    except Exception:
        pass
    return max(32 * 1024 * 1024, min(cap - 8 * 1024 * 1024, 112 * 1024 * 1024))


def _pick_tile(n, target, multiples=(128,)):
    """Largest divisor of n that is <= target and a multiple of one of
    `multiples` (tried in order); falls back to n (full dim, always legal)."""
    if n <= target:
        return n
    for m in multiples:
        for cand in range((target // m) * m, 0, -m):
            if n % cand == 0:
                return cand
    # TODO(synk): add a masked remainder path for spatial sizes with no nice
    # divisor (e.g. 60x60); full-N blocks are correct but VMEM-heavy.
    return n


# -----------------------------------------------------------------------------
# Stage 1: q / k / v projections (the three 1x1 convs), channel-major,
# computed once per batch.  All matmuls are native NN MXU matmuls.
# -----------------------------------------------------------------------------
def _proj_kernel(x_ref, wq_ref, bq_ref, wk_ref, wv_ref, q_ref, k_ref, v_ref):
    x = x_ref[0].astype(wq_ref.dtype)                                   # (C, TN)
    q = jnp.dot(wq_ref[...], x, preferred_element_type=jnp.float32) + bq_ref[...]
    k = jnp.dot(wk_ref[...], x, preferred_element_type=jnp.float32)    # bk dropped
    v = jnp.dot(wv_ref[...], x, preferred_element_type=jnp.float32)    # gamma*Wv
    q_ref[0] = q.astype(q_ref.dtype)                                    # (C8, TN)
    k_ref[0] = k.astype(k_ref.dtype)                                    # (C8, TN)
    v_ref[0] = v.astype(v_ref.dtype)                                    # (C, TN)


# -----------------------------------------------------------------------------
# Stage 2: flash-style position attention + residual, K/V resident per batch.
#   s_t[a, b]   = <k_a, q_b>                (TK, TQ)  -- NN matmul
#   acc (C, TQ) += V_chunk (C, TK) @ p_t    (TK, TQ)  -- NN matmul
#   softmax stats m / l live as (1, TQ) lane vectors (no transposes anywhere).
# -----------------------------------------------------------------------------
def _attn_kernel(q_ref, k_ref, v_ref, xres_ref, bias_ref, out_ref,
                 m_sc, l_sc, acc_sc, *, tk, approx_recip, exp_dtype):
    n_kv = k_ref.shape[1]
    n_chunks = n_kv // tk

    m_sc[...] = jnp.full(m_sc.shape, -jnp.inf, dtype=m_sc.dtype)
    l_sc[...] = jnp.zeros_like(l_sc)
    acc_sc[...] = jnp.zeros_like(acc_sc)

    q = q_ref[0]                                                        # (C8, TQ)
    for j in range(n_chunks):                                           # static unroll
        k_chunk = k_ref[0, pl.ds(j * tk, tk), :]                        # (TK, C8)
        v_chunk = v_ref[0, :, pl.ds(j * tk, tk)]                        # (C, TK)
        s_t = jnp.dot(k_chunk, q, preferred_element_type=jnp.float32)   # (TK, TQ)

        m_prev = m_sc[...]                                              # (1, TQ)
        m_new = jnp.maximum(m_prev, jnp.max(s_t, axis=0, keepdims=True))
        alpha = jnp.exp(m_prev - m_new)                                 # (1, TQ) f32
        # exp in bf16 on the fast path (EUP ~2x on v6e/v7x); stats stay f32.
        p = jnp.exp((s_t - m_new).astype(exp_dtype))                    # (TK, TQ)

        l_sc[...] = alpha * l_sc[...] + jnp.sum(
            p.astype(jnp.float32), axis=0, keepdims=True)
        acc_sc[...] = alpha * acc_sc[...] + jnp.dot(
            v_chunk, p.astype(v_ref.dtype), preferred_element_type=jnp.float32)
        m_sc[...] = m_new

    inv_l = pl.reciprocal(l_sc[...], approx=approx_recip)               # EUP slot
    # out = gamma*(attn @ (Wv x)) + gamma*bv + x, all channel-major (C, TQ).
    out_ref[0] = (acc_sc[...] * inv_l + bias_ref[...] + xres_ref[0]
                  ).astype(out_ref.dtype)


def pam_forward(x_nchw, params, *, compute_dtype=jnp.bfloat16,
                tn_target=2048, tq_target=1024, tk_target=1024):
    """Pallas forward.  x_nchw: (B, C, H, W) float32."""
    B, C, H, W = x_nchw.shape
    N = H * W
    C8 = params["wq"].shape[0]
    cdt = jnp.dtype(compute_dtype)
    vmem_limit = _vmem_limit_bytes()

    # NCHW viewed as (B, C, N): a free reshape, no transpose.
    x_cn = x_nchw.reshape(B, C, N).astype(jnp.float32)

    gamma = params["gamma"].reshape(()).astype(jnp.float32)
    wq = params["wq"].astype(cdt)                        # (C8, C)
    wk = params["wk"].astype(cdt)                        # (C8, C)   bk dropped (exact)
    wv_g = (gamma * params["wv"]).astype(cdt)            # (C, C)    gamma folded in
    bq = params["bq"].reshape(C8, 1).astype(jnp.float32)
    bias_eff = (gamma * params["bv"]).reshape(C, 1).astype(jnp.float32)

    TN = _pick_tile(N, tn_target, multiples=(128,))      # lane dim -> 128-mult or full
    TQ = _pick_tile(N, tq_target, multiples=(128,))
    TK = _pick_tile(N, tk_target, multiples=(128, 8))    # in-kernel chunk only

    # ---------------- stage 1: projections, once per batch -------------------
    q_cm, k_cm, v_cm = pl.pallas_call(
        _proj_kernel,
        out_shape=(jax.ShapeDtypeStruct((B, C8, N), cdt),
                   jax.ShapeDtypeStruct((B, C8, N), cdt),
                   jax.ShapeDtypeStruct((B, C, N), cdt)),
        grid_spec=pltpu.PrefetchScalarGridSpec(
            num_scalar_prefetch=0,
            grid=(B, N // TN),
            in_specs=[
                pl.BlockSpec((1, C, TN), lambda b, n: (b, 0, n)),     # x (NCHW view)
                pl.BlockSpec((C8, C), lambda b, n: (0, 0)),           # Wq
                pl.BlockSpec((C8, 1), lambda b, n: (0, 0)),           # bq
                pl.BlockSpec((C8, C), lambda b, n: (0, 0)),           # Wk
                pl.BlockSpec((C, C), lambda b, n: (0, 0)),            # gamma * Wv
            ],
            out_specs=[
                pl.BlockSpec((1, C8, TN), lambda b, n: (b, 0, n)),
                pl.BlockSpec((1, C8, TN), lambda b, n: (b, 0, n)),
                pl.BlockSpec((1, C, TN), lambda b, n: (b, 0, n)),
            ],
        ),
        compiler_params=pltpu.CompilerParams(
            dimension_semantics=("parallel", "parallel"),
            vmem_limit_bytes=vmem_limit),
    )(x_cn, wq, bq, wk, wv_g)

    # k needs a spatial-major layout (B, N, C8) so the score matmul is native NN.
    # This is a tiny XLA transpose (N*C8 bf16 elements), not the old (B,N,C) f32 one.
    k_sm = jnp.swapaxes(k_cm, 1, 2)

    # ---------------- stage 2: flash attention + residual --------------------
    # TODO(synk): for very large N where resident K/V (~2*(C8+C)*N*dtype bytes)
    # would exceed VMEM, fall back to a K-tiled grid axis; not needed for DANet.
    approx = cdt != jnp.dtype(jnp.float32)
    exp_dtype = cdt if cdt == jnp.dtype(jnp.bfloat16) else jnp.dtype(jnp.float32)

    out_cn = pl.pallas_call(
        functools.partial(_attn_kernel, tk=TK, approx_recip=approx,
                          exp_dtype=exp_dtype),
        out_shape=jax.ShapeDtypeStruct((B, C, N), jnp.float32),
        grid_spec=pltpu.PrefetchScalarGridSpec(
            num_scalar_prefetch=0,
            grid=(B, N // TQ),
            in_specs=[
                pl.BlockSpec((1, C8, TQ), lambda b, qi: (b, 0, qi)),  # q tile (cm)
                pl.BlockSpec((1, N, C8), lambda b, qi: (b, 0, 0)),    # K resident (sm)
                pl.BlockSpec((1, C, N), lambda b, qi: (b, 0, 0)),     # V resident (cm)
                pl.BlockSpec((1, C, TQ), lambda b, qi: (b, 0, qi)),   # x residual
                pl.BlockSpec((C, 1), lambda b, qi: (0, 0)),           # gamma * bv
            ],
            out_specs=pl.BlockSpec((1, C, TQ), lambda b, qi: (b, 0, qi)),
            scratch_shapes=[
                pltpu.VMEM((1, TQ), jnp.float32),     # running row max
                pltpu.VMEM((1, TQ), jnp.float32),     # running row denominator
                pltpu.VMEM((C, TQ), jnp.float32),     # channel-major accumulator
            ],
        ),
        compiler_params=pltpu.CompilerParams(
            dimension_semantics=("parallel", "parallel"),
            vmem_limit_bytes=vmem_limit),
    )(q_cm, k_sm, v_cm, x_cn, bias_eff)

    # (B, C, N) -> NCHW (free reshape).
    return out_cn.reshape(B, C, H, W)


def pam_reference(x_nchw, params):
    """Pure-JAX reference matching the PyTorch forward exactly."""
    B, C, H, W = x_nchw.shape
    N = H * W
    x_flat = x_nchw.reshape(B, C, N)                                     # (B, C, N)
    q = jnp.einsum("oc,bcn->bon", params["wq"], x_flat) + params["bq"][None, :, None]
    k = jnp.einsum("oc,bcn->bon", params["wk"], x_flat) + params["bk"][None, :, None]
    v = jnp.einsum("oc,bcn->bon", params["wv"], x_flat) + params["bv"][None, :, None]
    proj_query = jnp.transpose(q, (0, 2, 1))                             # (B, N, C8)
    energy = jnp.einsum("bnc,bcm->bnm", proj_query, k)                   # (B, N, N)
    attention = jax.nn.softmax(energy, axis=-1)
    out = jnp.einsum("bcn,bmn->bcm", v, attention)                       # (B, C, N)
    out = out.reshape(B, C, H, W)
    return params["gamma"].reshape(()) * out + x_nchw


if __name__ == "__main__":
    B, C, H, W = 2, 32, 8, 8          # in_dim=32 -> query/key channels = 32 // 8 = 4
    C8 = C // 8

    key = jax.random.PRNGKey(0)
    kx, kq, kk, kv, kbq, kbk, kbv = jax.random.split(key, 7)

    x = jax.random.normal(kx, (B, C, H, W), dtype=jnp.float32)

    params = {
        # Conv2d 1x1 weights (out_ch, in_ch), kernel spatial dims squeezed out.
        "wq": 0.1 * jax.random.normal(kq, (C8, C), dtype=jnp.float32),
        "wk": 0.1 * jax.random.normal(kk, (C8, C), dtype=jnp.float32),
        "wv": 0.1 * jax.random.normal(kv, (C, C), dtype=jnp.float32),
        "bq": 0.1 * jax.random.normal(kbq, (C8,), dtype=jnp.float32),
        "bk": 0.1 * jax.random.normal(kbk, (C8,), dtype=jnp.float32),
        "bv": 0.1 * jax.random.normal(kbv, (C,), dtype=jnp.float32),
        # PyTorch inits gamma = zeros(1); use a nonzero deterministic value so the
        # attention path actually contributes to the checked output.
        "gamma": jnp.full((1,), 0.5, dtype=jnp.float32),
    }

    ref = jax.block_until_ready(pam_reference(x, params))

    # Exact-math check: same tiled/flash algorithm with f32 MXU operands.
    out_f32 = jax.block_until_ready(pam_forward(x, params, compute_dtype=jnp.float32))
    assert out_f32.shape == x.shape
    err32 = float(jnp.max(jnp.abs(out_f32 - ref)))
    assert jnp.allclose(out_f32, ref, rtol=1e-5, atol=1e-5), f"f32 max abs err = {err32}"

    # Performance path: bf16 operands / bf16 exp, f32 accumulation (looser tol).
    out_bf16 = jax.block_until_ready(pam_forward(x, params, compute_dtype=jnp.bfloat16))
    errbf = float(jnp.max(jnp.abs(out_bf16 - ref)))
    assert jnp.allclose(out_bf16, ref, rtol=2e-2, atol=2e-2), f"bf16 max abs err = {errbf}"

    print("KERNEL_OK")
</pallas_src>

<mosaic_0001>
module attributes {stable_mosaic.version = 11 : i64} {
  func.func @_proj_kernel(%arg0: i32, %arg1: i32, %arg2: memref<1x32x64xf32, #tpu.memory_space<vmem>>, %arg3: memref<4x32xf32, #tpu.memory_space<vmem>>, %arg4: memref<4x1xf32, #tpu.memory_space<vmem>>, %arg5: memref<4x32xf32, #tpu.memory_space<vmem>>, %arg6: memref<32x32xf32, #tpu.memory_space<vmem>>, %arg7: memref<1x4x64xf32, #tpu.memory_space<vmem>>, %arg8: memref<1x4x64xf32, #tpu.memory_space<vmem>>, %arg9: memref<1x32x64xf32, #tpu.memory_space<vmem>>) attributes {dimension_semantics = [#tpu.dimension_semantics<parallel>, #tpu.dimension_semantics<parallel>], iteration_bounds = array<i64: 2, 1>, scalar_prefetch = 0 : i64, scratch_operands = 0 : i64, tpu.core_type = #tpu.core_type<tc>, window_params = [{transform_indices = @transform_0, window_bounds = array<i64: 1, 32, 64>}, {pipeline_mode = #tpu.pipeline_mode<synchronous>, transform_indices = @transform_1, window_bounds = array<i64: 4, 32>}, {pipeline_mode = #tpu.pipeline_mode<synchronous>, transform_indices = @transform_2, window_bounds = array<i64: 4, 1>}, {pipeline_mode = #tpu.pipeline_mode<synchronous>, transform_indices = @transform_3, window_bounds = array<i64: 4, 32>}, {pipeline_mode = #tpu.pipeline_mode<synchronous>, transform_indices = @transform_4, window_bounds = array<i64: 32, 32>}, {transform_indices = @transform_5, window_bounds = array<i64: 1, 4, 64>}, {transform_indices = @transform_6, window_bounds = array<i64: 1, 4, 64>}, {transform_indices = @transform_7, window_bounds = array<i64: 1, 32, 64>}]} {
    %c0 = arith.constant 0 : index
    %c0_0 = arith.constant 0 : index
    %c0_1 = arith.constant 0 : index
    %0 = vector.load %arg2[%c0, %c0_0, %c0_1] : memref<1x32x64xf32, #tpu.memory_space<vmem>>, vector<1x32x64xf32>
    %1 = vector.shape_cast %0 : vector<1x32x64xf32> to vector<32x64xf32>
    %c0_2 = arith.constant 0 : index
    %c0_3 = arith.constant 0 : index
    %2 = vector.load %arg3[%c0_2, %c0_3] : memref<4x32xf32, #tpu.memory_space<vmem>>, vector<4x32xf32>
    %cst = arith.constant dense<0.000000e+00> : vector<4x64xf32>
    %3 = tpu.matmul %2, %1, %cst {dimension_numbers = #tpu.dot_dimension_numbers<[1], [0], [0], [1], [0, 0, 1, 1], [], []>} : vector<4x32xf32>, vector<32x64xf32>, vector<4x64xf32> -> vector<4x64xf32>
    %c0_4 = arith.constant 0 : index
    %c0_5 = arith.constant 0 : index
    %4 = vector.load %arg4[%c0_4, %c0_5] : memref<4x1xf32, #tpu.memory_space<vmem>>, vector<4x1xf32>
    %5 = vector.broadcast %4 : vector<4x1xf32> to vector<4x64xf32>
    %6 = arith.addf %3, %5 : vector<4x64xf32>
    %c0_6 = arith.constant 0 : index
    %c0_7 = arith.constant 0 : index
    %7 = vector.load %arg5[%c0_6, %c0_7] : memref<4x32xf32, #tpu.memory_space<vmem>>, vector<4x32xf32>
    %cst_8 = arith.constant dense<0.000000e+00> : vector<4x64xf32>
    %8 = tpu.matmul %7, %1, %cst_8 {dimension_numbers = #tpu.dot_dimension_numbers<[1], [0], [0], [1], [0, 0, 1, 1], [], []>} : vector<4x32xf32>, vector<32x64xf32>, vector<4x64xf32> -> vector<4x64xf32>
    %c0_9 = arith.constant 0 : index
    %c0_10 = arith.constant 0 : index
    %9 = vector.load %arg6[%c0_9, %c0_10] : memref<32x32xf32, #tpu.memory_space<vmem>>, vector<32x32xf32>
    %cst_11 = arith.constant dense<0.000000e+00> : vector<32x64xf32>
    %10 = tpu.matmul %9, %1, %cst_11 {dimension_numbers = #tpu.dot_dimension_numbers<[1], [0], [0], [1], [0, 0, 1, 1], [], []>} : vector<32x32xf32>, vector<32x64xf32>, vector<32x64xf32> -> vector<32x64xf32>
    %c0_12 = arith.constant 0 : index
    %c0_13 = arith.constant 0 : index
    %c0_14 = arith.constant 0 : index
    %11 = vector.load %arg7[%c0_12, %c0_13, %c0_14] : memref<1x4x64xf32, #tpu.memory_space<vmem>>, vector<1x4x64xf32>
    %12 = vector.shape_cast %11 : vector<1x4x64xf32> to vector<4x64xf32>
    %13 = vector.shape_cast %6 : vector<4x64xf32> to vector<1x4x64xf32>
    tpu.vector_store %arg7[%c0_12, %c0_13, %c0_14], %13 {strides = array<i32>} : memref<1x4x64xf32, #tpu.memory_space<vmem>>, vector<1x4x64xf32>,
    %c0_15 = arith.constant 0 : index
    %c0_16 = arith.constant 0 : index
    %c0_17 = arith.constant 0 : index
    %14 = vector.load %arg8[%c0_15, %c0_16, %c0_17] : memref<1x4x64xf32, #tpu.memory_space<vmem>>, vector<1x4x64xf32>
    %15 = vector.shape_cast %14 : vector<1x4x64xf32> to vector<4x64xf32>
    %16 = vector.shape_cast %8 : vector<4x64xf32> to vector<1x4x64xf32>
    tpu.vector_store %arg8[%c0_15, %c0_16, %c0_17], %16 {strides = array<i32>} : memref<1x4x64xf32, #tpu.memory_space<vmem>>, vector<1x4x64xf32>,
    %c0_18 = arith.constant 0 : index
    %c0_19 = arith.constant 0 : index
    %c0_20 = arith.constant 0 : index
    %17 = vector.load %arg9[%c0_18, %c0_19, %c0_20] : memref<1x32x64xf32, #tpu.memory_space<vmem>>, vector<1x32x64xf32>
    %18 = vector.shape_cast %17 : vector<1x32x64xf32> to vector<32x64xf32>
    %19 = vector.shape_cast %10 : vector<32x64xf32> to vector<1x32x64xf32>
    tpu.vector_store %arg9[%c0_18, %c0_19, %c0_20], %19 {strides = array<i32>} : memref<1x32x64xf32, #tpu.memory_space<vmem>>, vector<1x32x64xf32>,
    return
  }
  func.func @transform_0(%arg0: i32, %arg1: i32) -> (i32, i32, i32) {
    %c0_i32 = arith.constant 0 : i32
    %c0_i32_0 = arith.constant 0 : i32
    return %arg0, %c0_i32, %arg1 : i32, i32, i32
  }
  func.func @transform_1(%arg0: i32, %arg1: i32) -> (i32, i32) {
    %c0_i32 = arith.constant 0 : i32
    %c0_i32_0 = arith.constant 0 : i32
    %c0_i32_1 = arith.constant 0 : i32
    return %c0_i32, %c0_i32_0 : i32, i32
  }
  func.func @transform_2(%arg0: i32, %arg1: i32) -> (i32, i32) {
    %c0_i32 = arith.constant 0 : i32
    %c0_i32_0 = arith.constant 0 : i32
    %c0_i32_1 = arith.constant 0 : i32
    return %c0_i32, %c0_i32_0 : i32, i32
  }
  func.func @transform_3(%arg0: i32, %arg1: i32) -> (i32, i32) {
    %c0_i32 = arith.constant 0 : i32
    %c0_i32_0 = arith.constant 0 : i32
    %c0_i32_1 = arith.constant 0 : i32
    return %c0_i32, %c0_i32_0 : i32, i32
  }
  func.func @transform_4(%arg0: i32, %arg1: i32) -> (i32, i32) {
    %c0_i32 = arith.constant 0 : i32
    %c0_i32_0 = arith.constant 0 : i32
    %c0_i32_1 = arith.constant 0 : i32
    return %c0_i32, %c0_i32_0 : i32, i32
  }
  func.func @transform_5(%arg0: i32, %arg1: i32) -> (i32, i32, i32) {
    %c0_i32 = arith.constant 0 : i32
    %c0_i32_0 = arith.constant 0 : i32
    return %arg0, %c0_i32, %arg1 : i32, i32, i32
  }
  func.func @transform_6(%arg0: i32, %arg1: i32) -> (i32, i32, i32) {
    %c0_i32 = arith.constant 0 : i32
    %c0_i32_0 = arith.constant 0 : i32
    return %arg0, %c0_i32, %arg1 : i32, i32, i32
  }
  func.func @transform_7(%arg0: i32, %arg1: i32) -> (i32, i32, i32) {
    %c0_i32 = arith.constant 0 : i32
    %c0_i32_0 = arith.constant 0 : i32
    return %arg0, %c0_i32, %arg1 : i32, i32, i32
  }
}

</mosaic_0001>

<bundles_post_ra>
// kernel: tpu_custom_call.1
= control target key start
LH: loop header
LB: loop body
LE: loop exit
PB: predicated region body
PF: predicated region fallthrough
CT: control target
= control target key end

     0   :  { %s1622_s0 = inlined_call_operand.hbm [shape: f32[2,32,64], index: 0, kind: input, shape index: {}]   ;;  %s1623_s1 = inlined_call_operand.vmem [shape: f32[4,32], index: 1, kind: input, shape index: {}]   ;;  %s1624_s2 = inlined_call_operand.vmem [shape: f32[4,1], index: 2, kind: input, shape index: {}]   ;;  %s1625_s3 = inlined_call_operand.vmem [shape: f32[4,32], index: 3, kind: input, shape index: {}]   ;;  %s1626_s4 = inlined_call_operand.hbm [shape: f32[32,32], index: 4, kind: input, shape index: {}]   ;;  %s1627_s5 = inlined_call_operand.hbm [shape: f32[2,4,64], index: 5, kind: output, shape index: {0}]   ;;  %s1628_s6 = inlined_call_operand.hbm [shape: f32[2,4,64], index: 6, kind: output, shape index: {1}]   ;;  %s1629_s7 = inlined_call_operand.hbm [shape: f32[2,32,64], index: 7, kind: output, shape index: {2}]  }
   0x1   :  { %1637 = sst [smem:[#allocation15_spill]] %s1622_s0 }
   0x2   :  { %1638 = sst [smem:[#allocation16_spill]] %s1623_s1 }
   0x3   :  { %1639 = sst [smem:[#allocation17_spill]] %s1626_s4 }
   0x4   :  { %13 = vsyncpa [#allocation3], 0 }
   0x5   :  { %15 = vsyncpa [#allocation3 + $0x1], 0 }
   0x6   :  { %16 = vsyncpa [#allocation6], 0 }
   0x7   :  { %17 = vsyncpa [#allocation4], 0 }
   0x8   :  { %19 = vsyncpa [#allocation4 + $0x1], 0 }
   0x9   :  { %20 = vsyncpa [#allocation9], 0 }
   0xa   :  { %22 = vsyncpa [#allocation9 + $0x1], 0  ;;  %s1286_s24 = smov 0   ;;  %s1288_s25 = smov 0  }
   0xb   :  { %s1290_s26 = smov 0   ;;  %s1292_s27 = smov 0  }
   0xc   :  { %s1294_s28 = smov 0   ;;  %s1296_s29 = smov 0  }
   0xd LB: > { %s1317_s30 = sadd.s32 4294967295, %s1231_s29   ;;  %s1633_s8 = sadd.s32 4294967294, %s1231_s29   ;;  %s1231_s29 = sphi %s1296_s29, %s28_s29   ;;  %s1227_s28 = sphi %s1294_s28, %s1667_s28   ;;  %s1223_s27 = sphi %s1292_s27, %s1666_s27   ;;  %s1219_s26 = sphi %s1290_s26, %s1665_s26   ;;  %s1215_s25 = sphi %s1288_s25, %s1664_s25   ;;  %s1211_s24 = sphi %s1286_s24, %s1663_s24  }
   0xe   : > { %p62_p0 = scmp.ne.s32.totalorder %s1215_s25, %s1211_s24  ;;  %p1630_p1 = scmp.eq.s32.totalorder %s1317_s30, 0 }
   0xf   : > { %p178_p3 = scmp.eq.s32.totalorder %s1633_s8, 1  ;;  %p832_p5 = scmp.ge.s32.totalorder %s1231_s29, 1 }
  0x10   : > { %p1328_p4 = por %p1630_p1, %p62_p0  ;;  %p241_p7 = scmp.lt.s32.totalorder %s1231_s29, 3 }
  0x11   : > { %p1333_p6 = por %p178_p3, %p62_p0  ;;  %s1233_s12 = smov [#allocation5]  }
  0x12   : > { %s1640_s9 = scalar_select %p1328_p4, 1, 0 }
  0x13   : > { %s1641_s10 = scalar_select %p1333_p6, 1, 0 }
  0x14   : > { %p1338_p8 = pnand %p832_p5, %p241_p7  ;;  %s262_s13 = sshll.u32 %s1233_s12, 4  ;;  %s263_s13 = int_to_ptr.vmem [resolvable:$true] %s262_s13 }
  0x15   : > { %s40_s15 = sadd.s32 1, %s1227_s28  ;;  %s1644_s4 = sld [smem:[#allocation17_spill]] }
  0x16   : > { %s1642_s11 = scalar_select %p1338_p8, 1, 0 }
  0x17   : > { %p947_p9 = pneg %p1338_p8 }
  0x19   : > { %p1347_p11 = pnand %p947_p9, %p1630_p1 }
  0x1b   : > { %s1027_s18 = scalar_lea.hbm %s1644_s4, 512  ;;  %p1029_p13 = pneg %p1347_p11 }
  0x1c   : > { %p1028_p12 = scmp.ne.s32.totalorder %s1644_s4, %s1027_s18  ;;  %p1034_p5 = scmp.lt.u32.totalorder %s1027_s18, %s1644_s4 }
  0x1e   : > { %p1030_p0 = pnand %p1029_p13, %p1028_p12 }
  0x20   : > { %p1031_p3 = pneg %p1030_p0 }
  0x22   : > { %p1036_p7 = pnand %p1034_p5, %p1031_p3 }
  0x24   : > { %1039 = shalt.err (!%p1036_p7)
}
  0x25   : > { %s1040_s23 = scalar_lea.vmem %s263_s13, 512  ;;  %p1048_p2 = scmp.lt.s32.totalorder %s263_s13, %s263_s13 }
  0x26   : > { %p1041_p9 = scmp.ne.s32.totalorder %s263_s13, %s1040_s23  ;;  %p1049_p6 = scmp.lt.s32.totalorder %s1040_s23, %s1040_s23 }
  0x28   : > { %p1043_p10 = pnand %p1041_p9, %p1029_p13  ;;  %p1050_p4 = por %p1049_p6, %p1048_p2 }
  0x2a   : > { %p1044_p1 = pneg %p1043_p10 }
  0x2c   : > { %p1051_p8 = pnand %p1050_p4, %p1044_p1 }
  0x2e   : > { %1054 = shalt.err (!%p1051_p8)
}
  0x2f   : > { %s1634_s12 = smov 128   ;;  %s1635_s16 = smov 8  }
  0x30   : > { %950 = dma.hbm_to_vmem [thread:$0]  (!%p1347_p11), %s1644_s4, 512, %s263_s13, [#allocation6], %s1634_s12, %s1634_s12, %s1635_s16  }
  0x31   : > { %p42_p1 = scmp.ge.s32.totalorder %s40_s15, 2  ;;  %s49_s19 = sadd.s32 1, %s1219_s26 }
  0x32   : > { %p56_p2 = scmp.ne.s32.totalorder %s1219_s26, %s1215_s25  ;;  %p57_p4 = scmp.eq.s32.totalorder %s1231_s29, 0 }
  0x33   : > { %s1669_s15 = smov (%p42_p1, %s40_s15), 0  ;;  %p1646_p8 = scmp.eq.s32.totalorder %s1317_s30, 1 }
  0x34   : > { %p1377_p6 = por %p57_p4, %p56_p2  ;;  %s44_s21 = ssub.s32 %s1227_s28, %s1669_s15 }
  0x35   : > { %p1383_p10 = por %p1646_p8, %p56_p2  ;;  %p966_p12 = scmp.lt.s32.totalorder %s1231_s29, 2 }
  0x36   : > { %p47_p11 = scmp.eq.s32.totalorder %s44_s21, 0  ;;  %s276_s13 = sand.u32 1, %s1219_s26  }
  0x37   : > { %s835_s22 = sshll.u32 %s276_s13, 5  ;;  %s859_s17 = sshll.u32 %s1227_s28, 9 }
  0x38   : > { %s1392_s23 = scalar_select %p47_p11, %s1219_s26, %s49_s19  }
  0x39   : > { %s1648_s0 = sld [smem:[#allocation15_spill]]  ;;  %s280_s16 = scalar_lea.vmem [#allocation2], %s835_s22 }
  0x3a   : > { %s288_s4 = sshll.u32 %s280_s16, 4  ;;  %p1404_p13 = pnand %p966_p12, %p1377_p6  ;;  %s1400_s4 = int_to_ptr.vmem [resolvable:$true] %s288_s4 }
  0x3b   : > { %s1408_s19 = scalar_lea.sflag [#allocation3], %s276_s13 }
  0x3c   : > { %p1057_p3 = pneg %p1404_p13 }
  0x3f   : > { %s1398_s12 = scalar_lea.hbm %s1648_s0, %s859_s17  ;;  %s1060_s20 = scalar_lea.hbm %s1648_s0, 1024 }
  0x40   : > { %s1055_s8 = scalar_lea.hbm %s1398_s12, 512  ;;  %p1061_p9 = scmp.lt.u32.totalorder %s1398_s12, %s1648_s0 }
  0x41   : > { %p1056_p0 = scmp.ne.s32.totalorder %s1398_s12, %s1055_s8  ;;  %p1062_p1 = scmp.lt.u32.totalorder %s1060_s20, %s1055_s8 }
  0x42   : > { %p1064_p4 = scmp.lt.u32.totalorder %s1055_s8, %s1398_s12 }
  0x43   : > { %p1058_p5 = pnand %p1057_p3, %p1056_p0  ;;  %p1063_p2 = por %p1062_p1, %p1061_p9 }
  0x45   : > { %p1059_p7 = pneg %p1058_p5  ;;  %p1065_p6 = por %p1064_p4, %p1063_p2 }
  0x47   : > { %p1066_p8 = pnand %p1065_p6, %p1059_p7 }
  0x49   : > { %1069 = shalt.err (!%p1066_p8)
}
  0x4a   : > { %s1070_s13 = scalar_lea.vmem %s1400_s4, 512  ;;  %s1236_s16 = smov [#allocation2]  }
  0x4b   : > { %p1071_p12 = scmp.ne.s32.totalorder %s1400_s4, %s1070_s13  ;;  %s1075_s22 = sshll.u32 %s1236_s16, 4  ;;  %s1076_s22 = int_to_ptr.vmem [resolvable:$false] %s1075_s22 }
  0x4c   : > { %s1077_s17 = scalar_lea.vmem %s1076_s22, 1024  ;;  %p1078_p5 = scmp.lt.s32.totalorder %s1400_s4, %s1076_s22 }
  0x4d   : > { %p1073_p11 = pnand %p1071_p12, %p1057_p3  ;;  %p1079_p9 = scmp.lt.s32.totalorder %s1077_s17, %s1070_s13 }
  0x4f   : > { %p1074_p0 = pneg %p1073_p11  ;;  %p1080_p1 = por %p1079_p9, %p1078_p5 }
  0x51   : > { %p1081_p2 = pnand %p1080_p1, %p1074_p0 }
  0x53   : > { %1084 = shalt.err (!%p1081_p2)
}
  0x54   : > { %s1650_s8 = smov 8   ;;  %s1651_s20 = smov 128  }
  0x55   : > { %954 = dma.hbm_to_vmem [thread:$0]  (!%p1404_p13), %s1398_s12, 512, %s1400_s4, %s1408_s19, %s1651_s20, %s1651_s20, %s1650_s8  }
  0x56   : > { %p1652_p3 = scmp.ne.s32.totalorder %s1642_s11, 0 }
  0x57   : > { %s1442_s18 = sand.u32 (!%p1652_p3), 1, %s1215_s25   ;;  %p1653_p7 = scmp.ne.s32.totalorder (!%p1652_p3), %s1640_s9, 0 }
  0x58   : > { %300 = sbr.rel (%p1652_p3) target bundleno = 388 (0x184), region = 40  ;;  %s839_s13 = sshll.u32 (!%p1652_p3), %s1442_s18, 5 }
  0x59   : > { %s303_s16 = scalar_lea.sflag (!%p1652_p3), [#allocation3], %s1442_s18  ;;  %s306_s21 = scalar_lea.vmem (!%p1652_p3), [#allocation2], %s839_s13 }
  0x5f   : > { %1194 = dma.done.wait (%p1653_p7), %s303_s16, 512  }
  0x60   : > { %1196 = vsyncadd (%p1653_p7), %s303_s16, 4294966784  ;;  %p1654_p13 = scmp.eq.s32.totalorder %s1317_s30, 0 }
  0x62   : > { %1198 = dma.done.wait (%p1654_p13), [#allocation6], 512   ;;  %p1655_p4 = pmov %p1654_p13 }
  0x63   : > { %v1237_v0 = vmov 0.0|0.0   ;;  %vm1238_vm0 = vmmov 0   ;;  %v1239_v1 = vmov 0.0   ;;  %v1240_v2 = vmov 0   ;;  %v351_v3 = vld [vmem:[%s306_s21] sm:$0xff]  ;;  %v352_v4 = vld [vmem:[%s306_s21 + $0x8] sm:$0xff] }
  0x64   : > { %1200 = vsyncadd (%p1655_p4), [#allocation6], 4294966784  ;;  %915 = vmatprep.subr.bf16.mxu1 %v1237_v0  ;;  %887 = vmatprep.mubr.msk.f32.mxu1 %vm1238_vm0, %v1239_v1  ;;  %v353_v5 = vld [vmem:[%s306_s21 + $0x10] sm:$0xff]  ;;  %v916_v6 = vpack.c.bf16 %v352_v4, %v351_v3  ;;  %v354_v7 = vld [vmem:[%s306_s21 + $0x18] sm:$0xff]  ;;  %vm362_vm1 = vcmask 261120   ;;  %s1656_s1 = sld [smem:[#allocation16_spill]] }
  0x65   : > { %1026 = vset.pattern.permute.xlu0 %v1240_v2  ;;  %v510_v8 = vld [vmem:[#allocation5] sm:$0xff]  ;;  %v919_v9 = vpack.c.bf16 %v354_v7, %v353_v5  ;;  %v511_v12 = vld [vmem:[#allocation5 + $0x8] sm:$0xff]  ;;  %v512_v13 = vld [vmem:[#allocation5 + $0x10] sm:$0xff]  ;;  %s841_s17 = sshll.u32 %s1442_s18, 2  ;;  %s1636_s8 = sshll.u32 %s1223_s27, 6  ;;  %vm614_vm2 = vcmask 523264  }
  0x66   : > { %909 = vmatprep.mubr.msk.f32.mxu0 %vm362_vm1, %v510_v8  ;;  %917 = vmatpush3.bf16.msra.mxu1 %v916_v6  ;;  %v356_v10 = vld [vmem:[%s1624_s2] sm:$0xf]  ;;  %v513_v14 = vld [vmem:[#allocation5 + $0x18] sm:$0xff]  ;;  %s336_s20 = scalar_lea.vmem [#allocation7], %s841_s17  ;;  %vm611_vm3 = vcmask 519168   ;;  %s1480_s9 = scalar_lea.hbm %s1627_s5, %s1636_s8 }
  0x67   : > { %928 = vmatprep.subr.bf16.mxu0 %v916_v6  ;;  %918 = vmatprep.subr.bf16.mxu1 %v1237_v0  ;;  %v436_v15 = vld [vmem:[%s1625_s3] sm:$0xf]  ;;  %s644_s16 = sshll.u32 %s336_s20, 4  ;;  %s1486_s11 = scalar_lea.vmem [#allocation10], %s839_s13  ;;  %s1482_s16 = int_to_ptr.vmem [resolvable:$true] %s644_s16 }
  0x68   : > { %930 = vmatpush3.bf16.msra.mxu0 %v916_v6  ;;  %359 = vperm.xlu0 %1026, %v356_v10   ;;  %s1494_s22 = scalar_lea.vmem [#allocation8], %s841_s17  ;;  %s860_s4 = sshll.u32 %s1223_s27, 9 }
  0x69   : > { %932 = vmatprep.subr.bf16.mxu0 %v919_v9  ;;  %s658_s21 = sshll.u32 %s1494_s22, 4  ;;  %s620_s13 = scalar_lea.sflag [#allocation4], %s1442_s18  ;;  %s1538_s21 = int_to_ptr.vmem [resolvable:$true] %s658_s21 }
  0x6a   : > { %920 = vmatpush3.bf16.msra.mxu1 %v919_v9  ;;  %v355_v11 = vld [vmem:[%s1656_s1] sm:$0xf]  ;;  %s1085_s8 = scalar_lea.vmem %s1482_s16, 64  ;;  %s1241_s0 = smov [#allocation7]  }
  0x6b   : > { %921 = vmatprep.subr.bf16.mxu1 %v1237_v0  ;;  %p1086_p6 = scmp.ne.s32.totalorder %s1482_s16, %s1085_s8  ;;  %s1089_s12 = sshll.u32 %s1241_s0, 4  ;;  %s1090_s12 = int_to_ptr.vmem [resolvable:$false] %s1089_s12 }
  0x6c   : > { %934 = vmatpush3.bf16.msra.mxu0 %v919_v9  ;;  %s1091_s1 = scalar_lea.vmem %s1090_s12, 128  ;;  %p1092_p11 = scmp.lt.s32.totalorder %s1482_s16, %s1090_s12 }
  0x6d   : > { %888 = vmatmul.mubr.msk.f32.vlgmr.msra.gmra.mrb[0].mxu1 %vm362_vm1, %v355_v11  ;;  %p1087_p8 = pnand %p1086_p6, %p1383_p10  ;;  %p1093_p0 = scmp.lt.s32.totalorder %s1091_s1, %s1085_s8 }
  0x6e   : > { %923 = vmatpush3.bf16.msra.mxu1 %v916_v6  ;;  %898 = vmatprep.mubr.msk.f32.mxu1 %vm1238_vm0, %v1239_v1 }
  0x6f   : > { %910 = vmatmul.mubr.msk.f32.vlgmr.msra.gmra.mrb[0].mxu0 %vm362_vm1, %v511_v12  ;;  %924 = vmatprep.subr.bf16.mxu1 %v1237_v0  ;;  %p1088_p12 = pneg %p1087_p8  ;;  %p1094_p5 = por %p1093_p0, %p1092_p11 }
  0x70   : > { %912 = vmatprep.mubr.msk.f32.mxu0 %vm362_vm1, %v512_v13 }
  0x71   : > { %p1095_p9 = pnand %p1094_p5, %p1088_p12 }
  0x72   : > { %926 = vmatpush3.bf16.msra.mxu1 %v919_v9 }
  0x73   : > { %913 = vmatmul.mubr.msk.f32.gmra.mrb[2].mxu0 %vm362_vm1, %v513_v14 }
  0x75   : > { %899 = vmatmul.mubr.msk.f32.vlgmr.msra.gmra.mrb[2].mxu1 %vm362_vm1, %v436_v15 }
  0xe7   : > { %v360_v16 = vpop.permute.xlu0 %359 }
 0x140   : > { %v432_v17 = vpop.f32.mrb[0].mxu1 }
 0x141   : > { %v433_v18 = vadd.f32 %v432_v17, %v360_v16  ;;  %v889_v19 = vpop.f32.mrb[1].mxu1 }
 0x142   : > { %v911_v20 = vpop.f32.mrb[0].mxu0 }
 0x143   : > { %616 = vst.msk [vmem:[%s1486_s11 + $0x8] sm:$0xff] %vm614_vm2, %v911_v20  ;;  %v592_v21 = vpop.f32.mrb[1].mxu0 }
 0x144   : > { %615 = vst.msk [vmem:[%s1486_s11] sm:$0xff] %vm614_vm2, %v592_v21 }
 0x145   : > { %612 = vst.msk [vmem:[%s336_s20] sm:$0xf] %vm611_vm3, %v433_v18 }
 0x146   : > { %1098 = shalt.err (!%p1095_p9)
}
 0x147   : > { %s1099_s18 = scalar_lea.hbm %s1480_s9, 64  ;;  %s1103_s0 = scalar_lea.hbm %s1627_s5, 128 }
 0x148   : > { %p1100_p1 = scmp.ne.s32.totalorder %s1480_s9, %s1099_s18  ;;  %p1104_p7 = scmp.lt.u32.totalorder %s1480_s9, %s1627_s5 }
 0x149   : > { %p1105_p13 = scmp.lt.u32.totalorder %s1103_s0, %s1099_s18  ;;  %p1107_p6 = scmp.lt.u32.totalorder %s1099_s18, %s1480_s9 }
 0x14a   : > { %p1101_p2 = pnand %p1100_p1, %p1383_p10 }
 0x14b   : > { %p1106_p4 = por %p1105_p13, %p1104_p7 }
 0x14c   : > { %p1102_p3 = pneg %p1101_p2 }
 0x14d   : > { %p1108_p8 = por %p1107_p6, %p1106_p4 }
 0x14f   : > { %p1109_p12 = pnand %p1108_p8, %p1102_p3 }
 0x151   : > { %1112 = shalt.err (!%p1109_p12)
}
 0x152   : > { %941 = dma.vmem_to_hbm [thread:$0]  (%p1383_p10), %s1482_s16, 64, %s1480_s9, %s620_s13   ;;  %v914_v22 = vpop.f32.mrb[2].mxu0  ;;  %v506_v24 = vpop.f32.mrb[2].mxu1 }
 0x153   : > { %s1657_s1 = sshll.u32 %s1486_s11, 4  ;;  %618 = vst.msk [vmem:[%s1486_s11 + $0x18] sm:$0xff] %vm614_vm2, %v914_v22  ;;  %v602_v23 = vpop.f32.mrb[3].mxu0  ;;  %s1658_s8 = sshll.u32 %s1223_s27, 6  ;;  %v900_v25 = vpop.f32.mrb[3].mxu1  ;;  %s1523_s1 = int_to_ptr.vmem [resolvable:$true] %s1657_s1 }
 0x154   : > { %s1532_s17 = scalar_lea.hbm %s1628_s6, %s1658_s8  ;;  %617 = vst.msk [vmem:[%s1486_s11 + $0x10] sm:$0xff] %vm614_vm2, %v602_v23  ;;  %s1545_s13 = scalar_lea.hbm %s1629_s7, %s860_s4 }
 0x155   : > { %613 = vst.msk [vmem:[%s1494_s22] sm:$0xf] %vm611_vm3, %v506_v24  ;;  %s1659_s20 = sand.u32 1, %s1317_s30   ;;  %s1113_s11 = scalar_lea.vmem %s1538_s21, 64 }
 0x156   : > { %s1551_s0 = scalar_lea.sflag [#allocation9], %s1659_s20  ;;  %p1114_p11 = scmp.ne.s32.totalorder %s1538_s21, %s1113_s11 }
 0x157   : > { %s1242_s27 = smov [#allocation8]  }
 0x158   : > { %p1115_p0 = pnand %p1114_p11, %p1383_p10  ;;  %s1117_s12 = sshll.u32 %s1242_s27, 4  ;;  %s1118_s12 = int_to_ptr.vmem [resolvable:$false] %s1117_s12 }
 0x159   : > { %s1119_s8 = scalar_lea.vmem %s1118_s12, 128  ;;  %p1120_p9 = scmp.lt.s32.totalorder %s1538_s21, %s1118_s12 }
 0x15a   : > { %p1116_p5 = pneg %p1115_p0  ;;  %p1121_p1 = scmp.lt.s32.totalorder %s1119_s8, %s1113_s11 }
 0x15c   : > { %p1122_p2 = por %p1121_p1, %p1120_p9 }
 0x15e   : > { %p1123_p3 = pnand %p1122_p2, %p1116_p5 }
 0x160   : > { %1126 = shalt.err (!%p1123_p3)
}
 0x161   : > { %s1127_s30 = scalar_lea.hbm %s1532_s17, 64  ;;  %s1131_s19 = scalar_lea.hbm %s1628_s6, 128 }
 0x162   : > { %p1128_p7 = scmp.ne.s32.totalorder %s1532_s17, %s1127_s30  ;;  %p1132_p6 = scmp.lt.u32.totalorder %s1532_s17, %s1628_s6 }
 0x163   : > { %p1133_p8 = scmp.lt.u32.totalorder %s1131_s19, %s1127_s30  ;;  %p1135_p11 = scmp.lt.u32.totalorder %s1127_s30, %s1532_s17 }
 0x164   : > { %p1129_p13 = pnand %p1128_p7, %p1383_p10 }
 0x165   : > { %p1134_p12 = por %p1133_p8, %p1132_p6 }
 0x166   : > { %p1130_p4 = pneg %p1129_p13 }
 0x167   : > { %p1136_p0 = por %p1135_p11, %p1134_p12 }
 0x169   : > { %p1137_p5 = pnand %p1136_p0, %p1130_p4 }
 0x16b   : > { %1140 = shalt.err (!%p1137_p5)
}
 0x16c   : > { %942 = dma.vmem_to_hbm [thread:$0]  (%p1383_p10), %s1538_s21, 64, %s1532_s17, %s1551_s0  }
 0x16d   : > { %s1141_s9 = scalar_lea.vmem %s1523_s1, 512  ;;  %s1243_s20 = smov [#allocation10]  }
 0x16e   : > { %p1142_p9 = scmp.ne.s32.totalorder %s1523_s1, %s1141_s9  ;;  %s1145_s11 = sshll.u32 %s1243_s20, 4  ;;  %s1146_s11 = int_to_ptr.vmem [resolvable:$false] %s1145_s11 }
 0x16f   : > { %s1147_s27 = scalar_lea.vmem %s1146_s11, 1024  ;;  %p1148_p3 = scmp.lt.s32.totalorder %s1523_s1, %s1146_s11 }
 0x170   : > { %p1143_p1 = pnand %p1142_p9, %p1383_p10  ;;  %p1149_p7 = scmp.lt.s32.totalorder %s1147_s27, %s1141_s9 }
 0x172   : > { %p1144_p2 = pneg %p1143_p1  ;;  %p1150_p13 = por %p1149_p7, %p1148_p3 }
 0x174   : > { %p1151_p4 = pnand %p1150_p13, %p1144_p2 }
 0x176   : > { %1154 = shalt.err (!%p1151_p4)
}
 0x177   : > { %s1155_s21 = scalar_lea.hbm %s1545_s13, 512  ;;  %s1159_s8 = scalar_lea.hbm %s1629_s7, 1024 }
 0x178   : > { %p1156_p6 = scmp.ne.s32.totalorder %s1545_s13, %s1155_s21  ;;  %p1160_p11 = scmp.lt.u32.totalorder %s1545_s13, %s1629_s7 }
 0x179   : > { %p1161_p0 = scmp.lt.u32.totalorder %s1159_s8, %s1155_s21  ;;  %p1163_p9 = scmp.lt.u32.totalorder %s1155_s21, %s1545_s13 }
 0x17a   : > { %p1157_p8 = pnand %p1156_p6, %p1383_p10 }
 0x17b   : > { %p1162_p5 = por %p1161_p0, %p1160_p11 }
 0x17c   : > { %p1158_p12 = pneg %p1157_p8 }
 0x17d   : > { %p1164_p1 = por %p1163_p9, %p1162_p5 }
 0x17f   : > { %p1165_p2 = pnand %p1164_p1, %p1158_p12 }
 0x181   : > { %1168 = shalt.err (!%p1165_p2)
}
 0x182   : > { %s1244_s4 = smov 128   ;;  %s1245_s19 = smov 8  }
 0x183   : > { %943 = dma.vmem_to_hbm [thread:$0]  (%p1383_p10), %s1523_s1, 512, %s1545_s13, %s1551_s0, %s1244_s4, %s1244_s4, %s1245_s19  }
 0x184 PF: > { %s687_s18 = sand.u32 1, %s1211_s24   ;;  %p1660_p3 = scmp.ne.s32.totalorder %s1641_s10, 0 }
 0x185   : > { %p1661_p7 = scmp.ge.s32.totalorder %s1231_s29, 2  ;;  %s688_s16 = scalar_lea.sflag [#allocation4], %s687_s18 }
 0x187   : > { %p956_p13 = pnand %p1661_p7, %p1660_p3 }
 0x189   : > { %1202 = dma.done.wait (!%p956_p13), %s688_s16, 64  }
 0x18a   : > { %1204 = vsyncadd (!%p956_p13), %s688_s16, 4294967232  ;;  %s1662_s9 = sadd.s32 4294967294, %s1231_s29  }
 0x18b   : > { %s696_s20 = sand.u32 1, %s1662_s9  }
 0x18c   : > { %s697_s11 = scalar_lea.sflag [#allocation9], %s696_s20 }
 0x18d   : > { %1206 = dma.done.wait (!%p956_p13), %s697_s11, 576  }
 0x18e   : > { %1208 = vsyncadd (!%p956_p13), %s697_s11, 4294966720  ;;  %s28_s29 = sadd.s32 1, %s1231_s29   ;;  %s1663_s24 = smov %s1215_s25 }
 0x18f   : > { %p25_p10 = scmp.ge.s32.totalorder %s28_s29, 4   ;;  %s1664_s25 = smov %s1219_s26 }
 0x190   : > { %s1665_s26 = smov %s1392_s23  ;;  %s1666_s27 = smov %s1227_s28 }
 0x191   : > { %s1667_s28 = smov %s1669_s15  ;;  %27 = sbr.rel (!%p25_p10) target bundleno = 13 (0xd), region = 121 }
 0x198   :  { %711 = vsyncpa [#allocation3], 1 }
 0x199   :  { %713 = vsyncpa [#allocation3 + $0x1], 1 }
 0x19a   :  { %714 = vsyncpa [#allocation6], 1 }
 0x19b   :  { %715 = vsyncpa [#allocation4], 1 }
 0x19c   :  { %717 = vsyncpa [#allocation4 + $0x1], 1 }
 0x19d   :  { %718 = vsyncpa [#allocation9], 1 }
 0x19e   :  { %720 = vsyncpa [#allocation9 + $0x1], 1 }

</bundles_post_ra>
